<compile_context>
chip_gen: v5e
topology: v5e:2x2
jax: 0.10.0
libtpu: 0.0.40
codegen_flags: <defaults>
</compile_context>

<pallas_src>
import functools

import jax
import jax.numpy as jnp
from jax import lax
from jax.experimental import pallas as pl
from jax.experimental.pallas import tpu as pltpu

INPUT_DIMS = 32          # input_dims
HIDDEN = 8               # Quantization_projector output dim
CODEBOOK_SIZE = 96       # CodebookSize
N_FACTORS = (1, 2, 4)    # N_factors -> N_tightness_levels = 3
DEFAULT_TILE_BATCH = 8192


def _round_up(n, m):
    return ((n + m - 1) // m) * m


def _cdiv(a, b):
    return (a + b - 1) // b


def _quantizer_kernel(x_ref, w1_ref, b1_ref, cbt_ref, c2h_ref, cbw2_ref, b2_ref,
                      out_ref, ind_ref, loss_ref, *, batch, masked):
    x = x_ref[...]                                             # (TB, D_in) f32
    # Quantization_projector: h = x @ W1 + b1  -> (TB, 8)
    h = jnp.dot(x, w1_ref[...], preferred_element_type=jnp.float32) + b1_ref[...]

    # Nearest codebook entry.  argmin_k ||h - cb_k||^2 == argmin_k (0.5*||cb_k||^2 - h.cb_k):
    # ||h||^2 is row-constant (dropped for the argmin) and 0.5*||cb_k||^2 is precomputed.
    cross = jnp.dot(h, cbt_ref[...],
                    preferred_element_type=jnp.float32)        # (TB, K) on the MXU
    score = c2h_ref[...] - cross                               # (TB, K), VPU broadcast-sub
    TB, K = score.shape

    # First-occurrence argmin along the codebook axis (matches torch argmin tie-break).
    iota_k = lax.broadcasted_iota(jnp.int32, (TB, K), 1)
    min_s = jnp.min(score, axis=1, keepdims=True)              # (TB, 1)
    ind = jnp.min(jnp.where(score == min_s, iota_k, K),
                  axis=1, keepdims=True)                       # (TB, 1) int32

    # Straight-through forward value is the selected code vector q; since out = q @ W2 + b2
    # and q = onehot @ cb, a single one-hot MXU pass over the fused operand cbW2 = cb @ W2
    # produces `out` directly (no explicit q gather, no second projection matmul).
    onehot = (iota_k == ind).astype(jnp.float32)               # (TB, K)
    out = jnp.dot(onehot, cbw2_ref[...],
                  preferred_element_type=jnp.float32) + b2_ref[...]
    out_ref[...] = out.astype(out_ref.dtype)
    ind_ref[...] = ind

    # Codebook-loss partial sum for this tile:  ||q - h||^2 = 2*min_score + ||h||^2
    # (half-norm scoring), clamped at 0 against cancellation; padded rows masked out.
    # Mean is taken in JAX.
    h2 = jnp.sum(h * h, axis=1, keepdims=True)                 # (TB, 1)
    loss_rows = jnp.maximum(2.0 * min_s + h2, 0.0)
    if masked:
        row = pl.program_id(0) * TB + lax.broadcasted_iota(jnp.int32, (TB, 1), 0)
        loss_rows = jnp.where(row < batch, loss_rows, 0.0)
    loss_ref[0, 0] = jnp.sum(loss_rows)


@functools.partial(jax.jit, static_argnames=("tile_batch",))
def quantizer_apply(x, params, tile_batch=DEFAULT_TILE_BATCH):
    """Runs the Pallas kernel. Returns (state, CBloss, codebook_indices)."""
    w1, b1, cb, w2, b2 = params
    B, D = x.shape
    K, H = cb.shape

    # Tile the batch: big tiles (amortize per-step overhead) but capped at ~B/4 rows so the
    # v7x megacore ("parallel" grid axis) gets >= 4 grid steps when the batch allows it.
    B8 = _round_up(B, 8)
    tb_cap = _round_up(_cdiv(B8, 4), 8)
    TB = max(8, min(_round_up(tile_batch, 8), tb_cap))
    num_tiles = _cdiv(B, TB)
    B_pad = num_tiles * TB
    if B_pad != B:
        x = jnp.pad(x, ((0, B_pad - B), (0, 0)))

    # Parameter-derived constants, precomputed once (tiny, resident in VMEM across tiles):
    #   cbT     : codebook transposed for the contraction-major MXU RHS layout
    #   c2_half : 0.5*||cb_k||^2 as a (1, K) row (score = c2_half - h.cb)
    #   cbW2    : cb @ W2 fused operand, so one one-hot matmul yields the back-projection.
    cbT = cb.T                                                   # (H, K)
    c2_half = 0.5 * jnp.sum(cb * cb, axis=1)[None, :]            # (1, K)
    cbW2 = jnp.dot(cb, w2, precision=lax.Precision.HIGHEST)      # (K, D)

    kernel = functools.partial(_quantizer_kernel, batch=B, masked=(B_pad != B))

    out, ind, loss_parts = pl.pallas_call(
        kernel,
        grid=(num_tiles,),
        in_specs=[
            pl.BlockSpec((TB, D), lambda i: (i, 0)),           # x: streams per tile
            pl.BlockSpec((D, H), lambda i: (0, 0)),            # w1: resident
            pl.BlockSpec((1, H), lambda i: (0, 0)),            # b1: resident
            pl.BlockSpec((H, K), lambda i: (0, 0)),            # cb^T: resident
            pl.BlockSpec((1, K), lambda i: (0, 0)),            # 0.5*||cb||^2: resident
            pl.BlockSpec((K, D), lambda i: (0, 0)),            # cb @ W2: resident
            pl.BlockSpec((1, D), lambda i: (0, 0)),            # b2: resident
        ],
        out_specs=(
            pl.BlockSpec((TB, D), lambda i: (i, 0)),           # state tile
            pl.BlockSpec((TB, 1), lambda i: (i, 0)),           # codebook indices (int32)
            pl.BlockSpec((1, 1), lambda i: (i, 0),
                         memory_space=pltpu.MemorySpace.SMEM), # per-tile loss partial
        ),
        out_shape=(
            jax.ShapeDtypeStruct((B_pad, D), x.dtype),
            jax.ShapeDtypeStruct((B_pad, 1), jnp.int32),
            jax.ShapeDtypeStruct((num_tiles, 1), jnp.float32),
        ),
        compiler_params=pltpu.CompilerParams(
            dimension_semantics=("parallel",)),                # megacore sharding on v7x
    )(x, w1, b1, cbT, c2_half, cbW2, b2)

    state = out[:B]
    extra_loss = jnp.sum(loss_parts) / jnp.float32(B * H)
    indices = ind[:B, 0]
    return state, extra_loss, indices


def quantizer_forward(x, params, tile_batch=DEFAULT_TILE_BATCH):
    """Forward pass of QuantizerFunction with Method == 'Quantization'.

    Returns (state, ExtraLoss, att_scores) like the PyTorch module.
    """
    state, extra_loss, _ = quantizer_apply(x, params, tile_batch=tile_batch)
    # att_scores = zeros(N_tightness_levels).unsqueeze(0).unsqueeze(1) -> (1, 1, 3)
    att_scores = jnp.zeros((1, 1, len(N_FACTORS)), jnp.float32)
    return state, extra_loss, att_scores


def quantizer_forward_ref(x, params):
    """Pure-JAX reference (same math, no Pallas) for correctness checking."""
    w1, b1, cb, w2, b2 = params
    h = jnp.dot(x, w1, precision=lax.Precision.HIGHEST) + b1
    d2 = jnp.sum(jnp.square(h[:, None, :] - cb[None, :, :]), axis=-1)
    ind = jnp.argmin(d2, axis=1)
    q = cb[ind]
    loss = jnp.mean(jnp.square(q - h))
    out = jnp.dot(q, w2, precision=lax.Precision.HIGHEST) + b2
    return out, loss, ind


def init_params(key):
    """Deterministic parameter init matching the module's shapes.

    nn.Linear(in, out) weight (out, in) is stored transposed as (in, out).
    """
    k1, k2, k3, k4, k5 = jax.random.split(key, 5)
    lim1 = 1.0 / (INPUT_DIMS ** 0.5)
    lim2 = 1.0 / (HIDDEN ** 0.5)
    w1 = jax.random.uniform(k1, (INPUT_DIMS, HIDDEN), jnp.float32, -lim1, lim1)
    b1 = jax.random.uniform(k2, (1, HIDDEN), jnp.float32, -lim1, lim1)
    cb = jax.random.normal(k3, (CODEBOOK_SIZE, HIDDEN), jnp.float32)
    w2 = jax.random.uniform(k4, (HIDDEN, INPUT_DIMS), jnp.float32, -lim2, lim2)
    b2 = jax.random.uniform(k5, (1, INPUT_DIMS), jnp.float32, -lim2, lim2)
    return (w1, b1, cb, w2, b2)


if __name__ == "__main__":
    key = jax.random.PRNGKey(0)
    kx, kp = jax.random.split(key)
    params = init_params(kp)

    # (batch, tile_batch): single-tile case, multi-tile + padded-tail case, and a
    # multi-tile case with TB > 8 (exercises the >=4-tile cap and masking together).
    for batch, tb in ((8, DEFAULT_TILE_BATCH), (20, 8), (100, 32)):
        x = jax.random.normal(jax.random.fold_in(kx, batch),
                              (batch, INPUT_DIMS), jnp.float32)

        state, extra_loss, indices = quantizer_apply(x, params, tile_batch=tb)
        jax.block_until_ready((state, extra_loss, indices))

        state_ref, loss_ref_v, ind_ref_v = quantizer_forward_ref(x, params)
        assert state.shape == (batch, INPUT_DIMS)
        assert indices.shape == (batch,)
        assert jnp.array_equal(indices, ind_ref_v.astype(jnp.int32))
        assert jnp.allclose(state, state_ref, atol=2e-3, rtol=2e-3)
        assert jnp.allclose(extra_loss, loss_ref_v, atol=2e-3, rtol=2e-3)

        # Module-shaped API (state, ExtraLoss, att_scores).
        s2, el2, att_scores = quantizer_forward(x, params, tile_batch=tb)
        jax.block_until_ready((s2, el2, att_scores))
        assert s2.shape == (batch, INPUT_DIMS)
        assert el2.shape == ()
        assert att_scores.shape == (1, 1, len(N_FACTORS))

    print("KERNEL_OK")
</pallas_src>

<mosaic_0001>
module attributes {stable_mosaic.version = 11 : i64} {
  func.func @_quantizer_kernel(%arg0: i32, %arg1: memref<8x32xf32, #tpu.memory_space<vmem>>, %arg2: memref<32x8xf32, #tpu.memory_space<vmem>>, %arg3: memref<1x8xf32, #tpu.memory_space<vmem>>, %arg4: memref<8x96xf32, #tpu.memory_space<vmem>>, %arg5: memref<1x96xf32, #tpu.memory_space<vmem>>, %arg6: memref<96x32xf32, #tpu.memory_space<vmem>>, %arg7: memref<1x32xf32, #tpu.memory_space<vmem>>, %arg8: memref<8x32xf32, #tpu.memory_space<vmem>>, %arg9: memref<8x1xi32, #tpu.memory_space<vmem>>, %arg10: memref<1x1xf32, #tpu.memory_space<smem>>) attributes {dimension_semantics = [#tpu.dimension_semantics<parallel>], iteration_bounds = array<i64: 1>, scalar_prefetch = 0 : i64, scratch_operands = 0 : i64, tpu.core_type = #tpu.core_type<tc>, window_params = [{transform_indices = @transform_0, window_bounds = array<i64: 8, 32>}, {pipeline_mode = #tpu.pipeline_mode<synchronous>, transform_indices = @transform_1, window_bounds = array<i64: 32, 8>}, {pipeline_mode = #tpu.pipeline_mode<synchronous>, transform_indices = @transform_2, window_bounds = array<i64: 1, 8>}, {pipeline_mode = #tpu.pipeline_mode<synchronous>, transform_indices = @transform_3, window_bounds = array<i64: 8, 96>}, {pipeline_mode = #tpu.pipeline_mode<synchronous>, transform_indices = @transform_4, window_bounds = array<i64: 1, 96>}, {pipeline_mode = #tpu.pipeline_mode<synchronous>, transform_indices = @transform_5, window_bounds = array<i64: 96, 32>}, {pipeline_mode = #tpu.pipeline_mode<synchronous>, transform_indices = @transform_6, window_bounds = array<i64: 1, 32>}, {transform_indices = @transform_7, window_bounds = array<i64: 8, 32>}, {transform_indices = @transform_8, window_bounds = array<i64: 8, 1>}, {transform_indices = @transform_9, window_bounds = array<i64: 1, 1>}]} {
    %c0 = arith.constant 0 : index
    %c0_0 = arith.constant 0 : index
    %0 = vector.load %arg1[%c0, %c0_0] : memref<8x32xf32, #tpu.memory_space<vmem>>, vector<8x32xf32>
    %c0_1 = arith.constant 0 : index
    %c0_2 = arith.constant 0 : index
    %1 = vector.load %arg2[%c0_1, %c0_2] : memref<32x8xf32, #tpu.memory_space<vmem>>, vector<32x8xf32>
    %cst = arith.constant dense<0.000000e+00> : vector<8x8xf32>
    %2 = tpu.matmul %0, %1, %cst {dimension_numbers = #tpu.dot_dimension_numbers<[1], [0], [0], [1], [0, 0, 1, 1], [], []>} : vector<8x32xf32>, vector<32x8xf32>, vector<8x8xf32> -> vector<8x8xf32>
    %c0_3 = arith.constant 0 : index
    %c0_4 = arith.constant 0 : index
    %3 = vector.load %arg3[%c0_3, %c0_4] : memref<1x8xf32, #tpu.memory_space<vmem>>, vector<1x8xf32>
    %4 = vector.broadcast %3 : vector<1x8xf32> to vector<8x8xf32>
    %5 = arith.addf %2, %4 : vector<8x8xf32>
    %c0_5 = arith.constant 0 : index
    %c0_6 = arith.constant 0 : index
    %6 = vector.load %arg4[%c0_5, %c0_6] : memref<8x96xf32, #tpu.memory_space<vmem>>, vector<8x96xf32>
    %cst_7 = arith.constant dense<0.000000e+00> : vector<8x96xf32>
    %7 = tpu.matmul %5, %6, %cst_7 {dimension_numbers = #tpu.dot_dimension_numbers<[1], [0], [0], [1], [0, 0, 1, 1], [], []>} : vector<8x8xf32>, vector<8x96xf32>, vector<8x96xf32> -> vector<8x96xf32>
    %c0_8 = arith.constant 0 : index
    %c0_9 = arith.constant 0 : index
    %8 = vector.load %arg5[%c0_8, %c0_9] : memref<1x96xf32, #tpu.memory_space<vmem>>, vector<1x96xf32>
    %9 = vector.broadcast %8 : vector<1x96xf32> to vector<8x96xf32>
    %10 = arith.subf %9, %7 : vector<8x96xf32>
    %11 = tpu.iota {dimensions = array<i32: 1>} : vector<8x96xi32>
    %cst_10 = arith.constant dense<0x7F800000> : vector<8xf32>
    %12 = vector.multi_reduction <minimumf>, %10, %cst_10 [1] : vector<8x96xf32> to vector<8xf32>
    %13 = vector.shape_cast %12 : vector<8xf32> to vector<8x1xf32>
    %14 = vector.broadcast %13 : vector<8x1xf32> to vector<8x96xf32>
    %15 = arith.cmpf oeq, %10, %14 : vector<8x96xf32>
    %c96_i32 = arith.constant 96 : i32
    %16 = vector.broadcast %c96_i32 : i32 to vector<8x96xi32>
    %17 = arith.select %15, %11, %16 : vector<8x96xi1>, vector<8x96xi32>
    %cst_11 = arith.constant dense<2147483647> : vector<8xi32>
    %18 = vector.multi_reduction <minsi>, %17, %cst_11 [1] : vector<8x96xi32> to vector<8xi32>
    %19 = vector.shape_cast %18 : vector<8xi32> to vector<8x1xi32>
    %20 = vector.broadcast %19 : vector<8x1xi32> to vector<8x96xi32>
    %21 = arith.cmpi eq, %11, %20 : vector<8x96xi32>
    %22 = arith.extui %21 : vector<8x96xi1> to vector<8x96xi32>
    %23 = arith.sitofp %22 : vector<8x96xi32> to vector<8x96xf32>
    %c0_12 = arith.constant 0 : index
    %c0_13 = arith.constant 0 : index
    %24 = vector.load %arg6[%c0_12, %c0_13] : memref<96x32xf32, #tpu.memory_space<vmem>>, vector<96x32xf32>
    %cst_14 = arith.constant dense<0.000000e+00> : vector<8x32xf32>
    %25 = tpu.matmul %23, %24, %cst_14 {dimension_numbers = #tpu.dot_dimension_numbers<[1], [0], [0], [1], [0, 0, 1, 1], [], []>} : vector<8x96xf32>, vector<96x32xf32>, vector<8x32xf32> -> vector<8x32xf32>
    %c0_15 = arith.constant 0 : index
    %c0_16 = arith.constant 0 : index
    %26 = vector.load %arg7[%c0_15, %c0_16] : memref<1x32xf32, #tpu.memory_space<vmem>>, vector<1x32xf32>
    %27 = vector.broadcast %26 : vector<1x32xf32> to vector<8x32xf32>
    %28 = arith.addf %25, %27 : vector<8x32xf32>
    %c0_17 = arith.constant 0 : index
    %c0_18 = arith.constant 0 : index
    %29 = vector.load %arg8[%c0_17, %c0_18] : memref<8x32xf32, #tpu.memory_space<vmem>>, vector<8x32xf32>
    tpu.vector_store %arg8[%c0_17, %c0_18], %28 {strides = array<i32>} : memref<8x32xf32, #tpu.memory_space<vmem>>, vector<8x32xf32>,
    %c0_19 = arith.constant 0 : index
    %c0_20 = arith.constant 0 : index
    %30 = vector.load %arg9[%c0_19, %c0_20] : memref<8x1xi32, #tpu.memory_space<vmem>>, vector<8x1xi32>
    tpu.vector_store %arg9[%c0_19, %c0_20], %19 {strides = array<i32>} : memref<8x1xi32, #tpu.memory_space<vmem>>, vector<8x1xi32>,
    %31 = arith.mulf %5, %5 : vector<8x8xf32>
    %cst_21 = arith.constant dense<0.000000e+00> : vector<8xf32>
    %32 = vector.multi_reduction <add>, %31, %cst_21 [1] : vector<8x8xf32> to vector<8xf32>
    %33 = vector.shape_cast %32 : vector<8xf32> to vector<8x1xf32>
    %cst_22 = arith.constant 2.000000e+00 : f32
    %34 = vector.broadcast %cst_22 : f32 to vector<8x1xf32>
    %35 = arith.mulf %34, %13 : vector<8x1xf32>
    %36 = arith.addf %35, %33 : vector<8x1xf32>
    %cst_23 = arith.constant 0.000000e+00 : f32
    %37 = vector.broadcast %cst_23 : f32 to vector<8x1xf32>
    %38 = arith.maximumf %36, %37 : vector<8x1xf32>
    %39 = vector.shape_cast %38 : vector<8x1xf32> to vector<1x8x1xf32>
    %cst_24 = arith.constant dense<0.000000e+00> : vector<1xf32>
    %40 = vector.multi_reduction <add>, %39, %cst_24 [1, 2] : vector<1x8x1xf32> to vector<1xf32>
    %41 = vector.shape_cast %40 : vector<1xf32> to vector<1x1x1xf32>
    %42 = vector.extract %41[0, 0, 0] : f32 from vector<1x1x1xf32>
    %c0_25 = arith.constant 0 : index
    %c0_26 = arith.constant 0 : index
    %43 = memref.load %arg10[%c0_25, %c0_26] : memref<1x1xf32, #tpu.memory_space<smem>>
    memref.store %42, %arg10[%c0_25, %c0_26] : memref<1x1xf32, #tpu.memory_space<smem>>
    return
  }
  func.func @transform_0(%arg0: i32) -> (i32, i32) {
    %c0_i32 = arith.constant 0 : i32
    %c0_i32_0 = arith.constant 0 : i32
    return %arg0, %c0_i32 : i32, i32
  }
  func.func @transform_1(%arg0: i32) -> (i32, i32) {
    %c0_i32 = arith.constant 0 : i32
    %c0_i32_0 = arith.constant 0 : i32
    %c0_i32_1 = arith.constant 0 : i32
    return %c0_i32, %c0_i32_0 : i32, i32
  }
  func.func @transform_2(%arg0: i32) -> (i32, i32) {
    %c0_i32 = arith.constant 0 : i32
    %c0_i32_0 = arith.constant 0 : i32
    %c0_i32_1 = arith.constant 0 : i32
    return %c0_i32, %c0_i32_0 : i32, i32
  }
  func.func @transform_3(%arg0: i32) -> (i32, i32) {
    %c0_i32 = arith.constant 0 : i32
    %c0_i32_0 = arith.constant 0 : i32
    %c0_i32_1 = arith.constant 0 : i32
    return %c0_i32, %c0_i32_0 : i32, i32
  }
  func.func @transform_4(%arg0: i32) -> (i32, i32) {
    %c0_i32 = arith.constant 0 : i32
    %c0_i32_0 = arith.constant 0 : i32
    %c0_i32_1 = arith.constant 0 : i32
    return %c0_i32, %c0_i32_0 : i32, i32
  }
  func.func @transform_5(%arg0: i32) -> (i32, i32) {
    %c0_i32 = arith.constant 0 : i32
    %c0_i32_0 = arith.constant 0 : i32
    %c0_i32_1 = arith.constant 0 : i32
    return %c0_i32, %c0_i32_0 : i32, i32
  }
  func.func @transform_6(%arg0: i32) -> (i32, i32) {
    %c0_i32 = arith.constant 0 : i32
    %c0_i32_0 = arith.constant 0 : i32
    %c0_i32_1 = arith.constant 0 : i32
    return %c0_i32, %c0_i32_0 : i32, i32
  }
  func.func @transform_7(%arg0: i32) -> (i32, i32) {
    %c0_i32 = arith.constant 0 : i32
    %c0_i32_0 = arith.constant 0 : i32
    return %arg0, %c0_i32 : i32, i32
  }
  func.func @transform_8(%arg0: i32) -> (i32, i32) {
    %c0_i32 = arith.constant 0 : i32
    %c0_i32_0 = arith.constant 0 : i32
    return %arg0, %c0_i32 : i32, i32
  }
  func.func @transform_9(%arg0: i32) -> (i32, i32) {
    %c0_i32 = arith.constant 0 : i32
    %c0_i32_0 = arith.constant 0 : i32
    return %arg0, %c0_i32 : i32, i32
  }
}

</mosaic_0001>

<bundles_post_ra>
// kernel: quantizer_apply.1
= control target key start
LH: loop header
LB: loop body
LE: loop exit
PB: predicated region body
PF: predicated region fallthrough
CT: control target
= control target key end

     0   :  { %15 = vsyncpa [#allocation3], 0  ;;  %s398_s0 = inlined_call_operand.vmem [shape: f32[8,32], index: 0, kind: input, shape index: {}]   ;;  %s399_s1 = inlined_call_operand.vmem [shape: f32[32,8], index: 1, kind: input, shape index: {}]   ;;  %s400_s2 = inlined_call_operand.vmem [shape: f32[1,8], index: 2, kind: input, shape index: {}]   ;;  %s401_s3 = inlined_call_operand.vmem [shape: f32[8,96], index: 3, kind: input, shape index: {}]   ;;  %s402_s4 = inlined_call_operand.vmem [shape: f32[1,96], index: 4, kind: input, shape index: {}]   ;;  %s403_s5 = inlined_call_operand.vmem [shape: f32[96,32], index: 5, kind: input, shape index: {}]   ;;  %s404_s6 = inlined_call_operand.vmem [shape: f32[1,32], index: 6, kind: input, shape index: {}]   ;;  %s405_s7 = inlined_call_operand.hbm [shape: f32[8,32], index: 7, kind: output, shape index: {0}]   ;;  %s406_s8 = inlined_call_operand.vmem [shape: s32[8,1], index: 8, kind: output, shape index: {1}]   ;;  %s407_s9 = inlined_call_operand.hbm [shape: f32[1,1], index: 9, kind: output, shape index: {2}]  }
   0x1   :  { %v35_v0 = vld [vmem:[%s399_s1 + $0x18] sm:$0xff]  ;;  %v34_v1 = vld [vmem:[%s399_s1 + $0x10] sm:$0xff]  ;;  %v33_v2 = vld [vmem:[%s399_s1 + $0x8] sm:$0xff] }
   0x2   :  { %56 = vmatpush.msra.mxu0 %v35_v0 }
   0x4   :  { %57 = vmatpush.msra.mxu0 %v34_v1 }
   0x5   :  { %16 = vsyncpa [#allocation4], 0  ;;  %v32_v3 = vld [vmem:[%s399_s1] sm:$0xff]  ;;  %vm40_vm0 = vcmask 261120   ;;  %vm65_vm1 = vcmask 64512   ;;  %vm96_vm2 = vcmask 785408   ;;  %v94_v15 = vlaneseq }
   0x6   :  { %58 = vmatpush.msra.mxu0 %v33_v2  ;;  %v31_v4 = vld [vmem:[%s398_s0] sm:$0xff]  ;;  %v131_v22 = vld [vmem:[%s403_s5 + $0x58] sm:$0xff]  ;;  %v130_v23 = vld [vmem:[%s403_s5 + $0x50] sm:$0xff]  ;;  %vm160_vm5 = vcmask 7168   ;;  %v268_v43 = vmov 0.0   ;;  %s188_s24 = sshll.u32 %s405_s7, 4  ;;  %s189_s24 = int_to_ptr.hbm [resolvable:$true] %s188_s24 }
   0x7   :  { %v64_v5 = vld [vmem:[%s401_s3] sm:$0xff]  ;;  %v95_v16 = vand.u32 127, %v94_v15  ;;  %143 = vmatpush.msra.mxu2 %v131_v22  ;;  %v129_v24 = vld [vmem:[%s403_s5 + $0x48] sm:$0xff]  ;;  %v127_v26 = vld [vmem:[%s403_s5 + $0x38] sm:$0xff]  ;;  %s270_s28 = smov [#allocation5]  }
   0x8   :  { %59 = vmatpush.msra.mxu0 %v32_v3  ;;  %84 = vmatpush.msra.mxu1 %v64_v5  ;;  %v225_v6 = vld [vmem:[%s400_s2] ss:$0 sm:$0xff]  ;;  %v126_v27 = vld [vmem:[%s403_s5 + $0x30] sm:$0xff]  ;;  %v125_v28 = vld [vmem:[%s403_s5 + $0x28] sm:$0xff] }
   0x9   :  { %216 = vmatmul.msk.f32.vlgmr.msra.gmra.mxu0 %vm40_vm0, %v31_v4  ;;  %v226_v11 = vld [vmem:[%s402_s4] ss:$0 sm:$0xff]  ;;  %144 = vmatpush.msra.mxu2 %v130_v23  ;;  %v123_v30 = vld [vmem:[%s403_s5 + $0x18] sm:$0xff]  ;;  %v122_v35 = vld [vmem:[%s403_s5 + $0x10] sm:$0xff] }
   0xa   :  { %v128_v25 = vld [vmem:[%s403_s5 + $0x40] sm:$0xff]  ;;  %v121_v36 = vld [vmem:[%s403_s5 + $0x8] sm:$0xff] }
   0xb   :  { %145 = vmatpush.msra.mxu2 %v129_v24  ;;  %v124_v29 = vld [vmem:[%s403_s5 + $0x20] sm:$0xff] }
   0xc   :  { %v120_v37 = vld [vmem:[%s403_s5] sm:$0xff] }
   0xd   :  { %146 = vmatpush.msra.mxu2 %v128_v25  ;;  %v227_v54 = vld [vmem:[%s404_s6] ss:$0 sm:$0xff]  ;;  %s199_s6 = sshll.u32 %s407_s9, 4  ;;  %s200_s6 = int_to_ptr.hbm [resolvable:$true] %s199_s6 }
   0xf   :  { %147 = vmatpush.msra.mxu2 %v127_v26 }
  0x11   :  { %148 = vmatpush.msra.mxu2 %v126_v27 }
  0x13   :  { %149 = vmatpush.msra.mxu2 %v125_v28 }
  0x15   :  { %150 = vmatpush.msra.mxu2 %v124_v29 }
  0x17   :  { %151 = vmatpush.msra.mxu2 %v123_v30 }
  0x19   :  { %152 = vmatpush.msra.mxu2 %v122_v35 }
  0x1b   :  { %153 = vmatpush.msra.mxu2 %v121_v36 }
  0x1d   :  { %154 = vmatpush.msra.mxu2 %v120_v37 }
  0x86   :  { %v61_v7 = vpop.f32.mrf.mxu0 }
  0x87   :  { %v62_v8 = vadd.f32 %v225_v6, %v61_v7 }
  0x89   :  { %217 = vmatmul.msk.f32.vlgmr.msra.gmra.mxu1 %vm65_vm1, %v62_v8  ;;  %v162_v9 = vmul.f32 %v62_v8, %v62_v8 }
  0x8b   :  { %v163_v10 = vsel %vm65_vm1, %v162_v9, 0.0 }
 0x106   :  { %v86_v12 = vpop.f32.mrf.mxu1 }
 0x107   :  { %v93_v13 = vsub.f32 %v226_v11, %v86_v12 }
 0x109   :  { %v97_v14 = vsel %vm96_vm2, %v93_v13, inf }
 0x10a   :  { %98 = vmin.xlane.f32.xlu0 %v97_v14 }
 0x17d   :  { %v99_v17 = vpop.xlane.xlu0 %98 }
 0x17e   :  { %vm100_vm3 = vcmp.eq.f32.partialorder %v93_v13, %v99_v17  ;;  %v166_v45 = vmul.f32 2.0, %v99_v17 }
 0x17f   :  { %v101_v18 = vsel %vm100_vm3, %v95_v16, 96 }
 0x180   :  { %v102_v19 = vsel %vm96_vm2, %v101_v18, 2147483647 }
 0x181   :  { %v104_v20 = vshra.s32 %v102_v19, 16  ;;  %v103_v31 = vand.u32 65535, %v102_v19 }
 0x183   :  { %v106_v21 = vcvt.s32.f32 %v104_v20  ;;  %v105_v33 = vcvt.s32.f32 %v103_v31 }
 0x185   :  { %107 = vmin.xlane.f32.xlu0 %v106_v21 }
 0x1f8   :  { %v108_v32 = vpop.xlane.xlu0 %107 }
 0x1f9   :  { %vm109_vm4 = vcmp.eq.f32.partialorder %v106_v21, %v108_v32  ;;  %v114_v38 = vcvt.f32.s32 %v108_v32 }
 0x1fa   :  { %v110_v34 = vsel %vm109_vm4, %v105_v33, inf }
 0x1fb   :  { %111 = vmin.xlane.f32.xlu1 %v110_v34  ;;  %v115_v40 = vshll.u32 %v114_v38, 16 }
 0x203   :  { %164 = vadd.xlane.f32.xlu1 %v163_v10 }
 0x26e   :  { %v112_v39 = vpop.xlane.xlu1 %111 }
 0x26f   :  { %v113_v41 = vcvt.f32.s32 %v112_v39 }
 0x271   :  { %v116_v42 = vadd.s32 %v115_v40, %v113_v41 }
 0x273   :  { %vm117_vm6 = vcmp.eq.s32.totalorder %v95_v16, %v116_v42  ;;  %161 = vst.msk [vmem:[%s406_s8] sm:$0xff] %vm160_vm5, %v116_v42  ;;  %s269_s8 = smov [#allocation2]  }
 0x274   :  { %v218_v44 = vsel %vm117_vm6, 1.0, %v268_v43  ;;  %s186_s3 = sshll.u32 %s269_s8, 4  ;;  %s187_s3 = int_to_ptr.vmem [resolvable:$true] %s186_s3 }
 0x275   :  { %219 = vmatmul.msk.f32.vlgmr.msra.gmra.mxu2 %vm96_vm2, %v218_v44 }
 0x276   :  { %v165_v46 = vpop.xlane.xlu1 %164 }
 0x277   :  { %v167_v47 = vadd.f32 %v166_v45, %v165_v46 }
 0x279   :  { %v168_v48 = vmax.f32 %v167_v47, 0.0 }
 0x27b   :  { %v169_v49 = vsel %vm160_vm5, %v168_v48, 0.0 }
 0x27c   :  { %170 = vadd.xlane.f32.xlu2 %v169_v49 }
 0x2ef   :  { %v171_v50 = vpop.xlane.xlu2 %170 }
 0x2f0   :  { %v172_v51 = vrot.slane %v171_v50, 4 }
 0x2f2   :  { %v173_v52 = vadd.f32 %v172_v51, %v171_v50 }
 0x2f4   :  { %v174_v53 = vrot.slane %v173_v52, 2 }
 0x2f6   :  { %v175_v55 = vadd.f32 %v174_v53, %v173_v52 }
 0x2f8   :  { %v156_v56 = vpop.f32.mrf.mxu2  ;;  %v176_v57 = vrot.slane %v175_v55, 1 }
 0x2f9   :  { %v157_v58 = vadd.f32 %v227_v54, %v156_v56 }
 0x2fa   :  { %v177_v59 = vadd.f32 %v176_v57, %v175_v55 }
 0x2fb   :  { %159 = vst.msk [vmem:[#allocation2] sm:$0xff] %vm40_vm0, %v157_v58 }
 0x2fc   :  { %220 = vpush %v177_v59  ;;  %191 = dma.vmem_to_hbm [thread:$0]  %s187_s3, 128, %s189_s24, [#allocation3]  }
 0x32d   :  { %s221_s27 = spop %220 }
 0x32e   :  { %180 = sst [smem:[#allocation5]] %s221_s27 }
 0x32f   :  { %202 = dma.smem_to_hbm %s270_s28, 16, %s200_s6, [#allocation4]  }
 0x330   :  { %264 = dma.done.wait [#allocation3], 128  }
 0x331   :  { %265 = vsyncadd [#allocation3], 4294967168 }
 0x332   :  { %266 = dma.done.wait [#allocation4], 16  }
 0x333   :  { %267 = vsyncadd [#allocation4], 4294967280 }
 0x334   :  { %213 = sfence }
 0x335   :  { %214 = vsyncpa [#allocation3], 1 }
 0x336   :  { %215 = vsyncpa [#allocation4], 1 }

</bundles_post_ra>
